<compile_context>
chip_gen: v7x
topology: tpu7x:2x2x1
jax: 0.10.0
libtpu: 0.0.40
codegen_flags: <defaults>
</compile_context>

<pallas_src>
import functools

import jax
import jax.numpy as jnp
from jax.experimental import pallas as pl
from jax.experimental.pallas import tpu as pltpu

_LANE = 128
_SUBLANE = 8
_MIN_GRID_STEPS = 8


def _ce_pixel_kernel(pred_ref, tgt_ref, loss_ref, *, num_classes, ignore_index):
    """Per-pixel cross entropy (reduction='none'; ignored pixels -> 0).

    pred_ref: (C, tile_rows, 128) in native dtype (bf16 stays bf16 in VMEM).
    tgt_ref:  (tile_rows, 128) int32.
    loss_ref: (tile_rows, 128) float32.
    """
    tgt = tgt_ref[...]

    # Pass 1: running max over channels (one (tile_rows,128) f32 slab live).
    m = pred_ref[0].astype(jnp.float32)
    for c in range(1, num_classes):
        m = jnp.maximum(m, pred_ref[c].astype(jnp.float32))

    # Pass 2: sum of exp and target-logit gather via select-accumulate.
    s = jnp.zeros_like(m)
    sel = jnp.zeros_like(m)
    for c in range(num_classes):
        pc = pred_ref[c].astype(jnp.float32)
        s = s + jnp.exp(pc - m)                       # EUP
        sel = sel + jnp.where(tgt == c, pc, 0.0)      # VPU

    lse = m + jnp.log(s)
    valid = tgt != ignore_index
    loss_ref[...] = jnp.where(valid, lse - sel, 0.0)


def _vmem_limit_bytes():
    """Scoped-VMEM limit: ~75% of per-core physical VMEM, clamped.
    128 MiB parts (v5e/v6e) -> 96 MiB; 64 MiB per-TC (v7x) -> 48 MiB."""
    try:
        cap = int(pltpu.get_tpu_info().vmem_capacity_bytes)
    except Exception:
        cap = 0
    if cap <= 0:
        cap = 64 * 1024 * 1024  # conservative fallback (v7x per-TC)
    return max(32 * 1024 * 1024, min(96 * 1024 * 1024, cap * 3 // 4))


def _pick_tile_rows(rows, n, c, pred_bytes, budget_bytes):
    """Largest multiple-of-8 row tile whose per-step footprint (double-buffered
    pred/tgt/out blocks + in-kernel f32 temporaries) fits the budget, capped so
    the grid keeps >= ~8 total steps."""
    if rows <= _SUBLANE:
        return rows  # block row-dim equals the full array dim (allowed)
    # Bytes in flight per row of 128 lanes:
    #   2x pred block (double-buffered), 2x int32 tgt, 2x f32 out,
    #   ~8 f32 (tile_rows,128) temporaries inside the kernel body.
    per_row = _LANE * (2 * c * pred_bytes + 2 * 4 + 2 * 4 + 8 * 4)
    max_rows = max(_SUBLANE, int(budget_bytes // per_row) // _SUBLANE * _SUBLANE)
    tile = min(max_rows, (rows // _SUBLANE) * _SUBLANE)
    # Keep at least ~_MIN_GRID_STEPS total grid steps (pipelining depth and
    # work units for v7x's two TensorCores).
    r_steps_target = max(1, -(-_MIN_GRID_STEPS // max(1, n)))
    if rows >= r_steps_target * _SUBLANE:
        cap = max(_SUBLANE, (rows // r_steps_target) // _SUBLANE * _SUBLANE)
        tile = min(tile, cap)
    return max(_SUBLANE, tile)


def _per_pixel_ce(predictions, targets, ignore_index):
    """predictions: [N, C, H, W]; targets: [N, H, W] int.
    Returns loss_map [N, S_pad] float32 with 0 at ignored / padded pixels."""
    N, C, H, W = predictions.shape
    S = H * W
    S_pad = -(-S // _LANE) * _LANE
    rows = S_pad // _LANE

    # Keep predictions in their native dtype on the HBM stream.
    pred = predictions.reshape(N, C, S)
    tgt = targets.reshape(N, S).astype(jnp.int32)
    if S_pad != S:
        # TODO(synk): this pad materializes an extra HBM copy of the largest
        # tensor; it only triggers when H*W is not a multiple of 128.
        pred = jnp.pad(pred, ((0, 0), (0, 0), (0, S_pad - S)))
        tgt = jnp.pad(tgt, ((0, 0), (0, S_pad - S)),
                      constant_values=ignore_index)
    pred = pred.reshape(N, C, rows, _LANE)
    tgt = tgt.reshape(N, rows, _LANE)

    vmem_limit = _vmem_limit_bytes()
    tile_rows = _pick_tile_rows(rows, N, C, pred.dtype.itemsize,
                                vmem_limit - 2 * 1024 * 1024)
    grid = (N, pl.cdiv(rows, tile_rows))

    kernel = functools.partial(_ce_pixel_kernel, num_classes=C,
                               ignore_index=ignore_index)
    loss_map = pl.pallas_call(
        kernel,
        out_shape=jax.ShapeDtypeStruct((N, rows, _LANE), jnp.float32),
        grid_spec=pltpu.PrefetchScalarGridSpec(
            num_scalar_prefetch=0,
            grid=grid,
            in_specs=[
                pl.BlockSpec((pl.Squeezed(), C, tile_rows, _LANE),
                             lambda n, r: (n, 0, r, 0)),
                pl.BlockSpec((pl.Squeezed(), tile_rows, _LANE),
                             lambda n, r: (n, r, 0)),
            ],
            out_specs=pl.BlockSpec((pl.Squeezed(), tile_rows, _LANE),
                                   lambda n, r: (n, r, 0)),
        ),
        compiler_params=pltpu.CompilerParams(
            dimension_semantics=("parallel", "parallel"),
            vmem_limit_bytes=vmem_limit,
        ),
    )(pred, tgt)

    return loss_map.reshape(N, S_pad)


def bootstrapped_cross_entropy_2d(predictions, targets, top_k=128,
                                  ignore_index=-100):
    """Forward pass of BootstrappedCrossEntropy2D.

    predictions: [N, C, H, W] float array, or a tuple of such arrays.
    targets:     [N, H, W] int array.
    Returns a scalar loss (float32).
    """
    if isinstance(predictions, (tuple, list)):
        preds = list(predictions)
    else:
        preds = [predictions]

    loss_fuse = jnp.float32(0.0)
    for p in preds:
        N, C, H, W = p.shape
        S = H * W
        if top_k > S:
            raise ValueError("top_k must be <= H*W")
        loss_map = _per_pixel_ce(p, targets, ignore_index)        # (N, S_pad)
        # Per-sample top-k of the worst pixel losses (kept in JAX).
        # Padded entries are exactly 0 and per-pixel CE >= 0, so they never
        # change a top-k *sum*.
        topk_vals, _ = jax.lax.top_k(loss_map, top_k)             # (N, top_k)
        per_sample = jnp.sum(topk_vals, axis=1) / float(top_k)
        loss_fuse = loss_fuse + jnp.sum(per_sample) / float(N)
    return loss_fuse


def _reference_loss(predictions, targets, top_k=128, ignore_index=-100):
    """Pure-JAX reference mirroring the PyTorch module (non-tuple path)."""
    N, C, H, W = predictions.shape
    S = H * W
    logp = jax.nn.log_softmax(predictions.astype(jnp.float32), axis=1)
    logp = logp.reshape(N, C, S)
    t = targets.reshape(N, S)
    mask = t == ignore_index
    tc = jnp.where(mask, 0, t)
    sel = jnp.take_along_axis(logp, tc[:, None, :], axis=1)[:, 0]
    per_pixel = jnp.where(mask, 0.0, -sel)                        # (N, S)
    topk_vals, _ = jax.lax.top_k(per_pixel, top_k)
    loss = jnp.sum(jnp.sum(topk_vals, axis=1) / float(top_k)) / float(N)
    return loss


if __name__ == "__main__":
    key = jax.random.PRNGKey(0)
    k_pred, k_tgt = jax.random.split(key)

    N, C, H, W = 2, 4, 16, 16
    top_k = 128
    predictions = jax.random.normal(k_pred, (N, C, H, W), dtype=jnp.float32)
    targets = jax.random.randint(k_tgt, (N, H, W), 0, C, dtype=jnp.int32)
    # exercise the ignore_index masking path
    targets = targets.at[0, :2, :].set(-100)

    loss = bootstrapped_cross_entropy_2d(predictions, targets,
                                         top_k=top_k, ignore_index=-100)
    loss = jax.block_until_ready(loss)

    ref = _reference_loss(predictions, targets, top_k=top_k, ignore_index=-100)
    assert jnp.allclose(loss, ref, atol=1e-5, rtol=1e-5), (loss, ref)

    print("KERNEL_OK")
</pallas_src>

<mosaic_0001>
module attributes {stable_mosaic.version = 11 : i64} {
  func.func @_ce_pixel_kernel(%arg0: i32, %arg1: i32, %arg2: memref<1x4x2x128xf32, #tpu.memory_space<vmem>>, %arg3: memref<1x2x128xi32, #tpu.memory_space<vmem>>, %arg4: memref<1x2x128xf32, #tpu.memory_space<vmem>>) attributes {dimension_semantics = [#tpu.dimension_semantics<parallel>, #tpu.dimension_semantics<parallel>], iteration_bounds = array<i64: 2, 1>, scalar_prefetch = 0 : i64, scratch_operands = 0 : i64, tpu.core_type = #tpu.core_type<tc>, window_params = [{transform_indices = @transform_0, window_bounds = array<i64: 1, 4, 2, 128>}, {transform_indices = @transform_1, window_bounds = array<i64: 1, 2, 128>}, {transform_indices = @transform_2, window_bounds = array<i64: 1, 2, 128>}]} {
    %c0 = arith.constant 0 : index
    %c0_0 = arith.constant 0 : index
    %c0_1 = arith.constant 0 : index
    %0 = vector.load %arg3[%c0, %c0_0, %c0_1] : memref<1x2x128xi32, #tpu.memory_space<vmem>>, vector<1x2x128xi32>
    %1 = vector.shape_cast %0 : vector<1x2x128xi32> to vector<2x128xi32>
    %c0_2 = arith.constant 0 : index
    %c0_3 = arith.constant 0 : index
    %c0_4 = arith.constant 0 : index
    %c0_5 = arith.constant 0 : index
    %2 = vector.load %arg2[%c0_2, %c0_3, %c0_4, %c0_5] : memref<1x4x2x128xf32, #tpu.memory_space<vmem>>, vector<1x1x2x128xf32>
    %3 = vector.shape_cast %2 : vector<1x1x2x128xf32> to vector<2x128xf32>
    %c0_6 = arith.constant 0 : index
    %c1 = arith.constant 1 : index
    %c0_7 = arith.constant 0 : index
    %c0_8 = arith.constant 0 : index
    %4 = vector.load %arg2[%c0_6, %c1, %c0_7, %c0_8] : memref<1x4x2x128xf32, #tpu.memory_space<vmem>>, vector<1x1x2x128xf32>
    %5 = vector.shape_cast %4 : vector<1x1x2x128xf32> to vector<2x128xf32>
    %6 = arith.maximumf %3, %5 : vector<2x128xf32>
    %c0_9 = arith.constant 0 : index
    %c2 = arith.constant 2 : index
    %c0_10 = arith.constant 0 : index
    %c0_11 = arith.constant 0 : index
    %7 = vector.load %arg2[%c0_9, %c2, %c0_10, %c0_11] : memref<1x4x2x128xf32, #tpu.memory_space<vmem>>, vector<1x1x2x128xf32>
    %8 = vector.shape_cast %7 : vector<1x1x2x128xf32> to vector<2x128xf32>
    %9 = arith.maximumf %6, %8 : vector<2x128xf32>
    %c0_12 = arith.constant 0 : index
    %c3 = arith.constant 3 : index
    %c0_13 = arith.constant 0 : index
    %c0_14 = arith.constant 0 : index
    %10 = vector.load %arg2[%c0_12, %c3, %c0_13, %c0_14] : memref<1x4x2x128xf32, #tpu.memory_space<vmem>>, vector<1x1x2x128xf32>
    %11 = vector.shape_cast %10 : vector<1x1x2x128xf32> to vector<2x128xf32>
    %12 = arith.maximumf %9, %11 : vector<2x128xf32>
    %cst = arith.constant 0.000000e+00 : f32
    %13 = vector.broadcast %cst : f32 to vector<2x128xf32>
    %cst_15 = arith.constant 0.000000e+00 : f32
    %14 = vector.broadcast %cst_15 : f32 to vector<2x128xf32>
    %c0_16 = arith.constant 0 : index
    %c0_17 = arith.constant 0 : index
    %c0_18 = arith.constant 0 : index
    %c0_19 = arith.constant 0 : index
    %15 = vector.load %arg2[%c0_16, %c0_17, %c0_18, %c0_19] : memref<1x4x2x128xf32, #tpu.memory_space<vmem>>, vector<1x1x2x128xf32>
    %16 = vector.shape_cast %15 : vector<1x1x2x128xf32> to vector<2x128xf32>
    %17 = arith.subf %16, %12 : vector<2x128xf32>
    %18 = math.exp %17 : vector<2x128xf32>
    %19 = arith.addf %13, %18 : vector<2x128xf32>
    %c0_i32 = arith.constant 0 : i32
    %20 = vector.broadcast %c0_i32 : i32 to vector<2x128xi32>
    %21 = arith.cmpi eq, %1, %20 : vector<2x128xi32>
    %cst_20 = arith.constant 0.000000e+00 : f32
    %22 = vector.broadcast %cst_20 : f32 to vector<2x128xf32>
    %23 = arith.select %21, %16, %22 : vector<2x128xi1>, vector<2x128xf32>
    %24 = arith.addf %14, %23 : vector<2x128xf32>
    %c0_21 = arith.constant 0 : index
    %c1_22 = arith.constant 1 : index
    %c0_23 = arith.constant 0 : index
    %c0_24 = arith.constant 0 : index
    %25 = vector.load %arg2[%c0_21, %c1_22, %c0_23, %c0_24] : memref<1x4x2x128xf32, #tpu.memory_space<vmem>>, vector<1x1x2x128xf32>
    %26 = vector.shape_cast %25 : vector<1x1x2x128xf32> to vector<2x128xf32>
    %27 = arith.subf %26, %12 : vector<2x128xf32>
    %28 = math.exp %27 : vector<2x128xf32>
    %29 = arith.addf %19, %28 : vector<2x128xf32>
    %c1_i32 = arith.constant 1 : i32
    %30 = vector.broadcast %c1_i32 : i32 to vector<2x128xi32>
    %31 = arith.cmpi eq, %1, %30 : vector<2x128xi32>
    %cst_25 = arith.constant 0.000000e+00 : f32
    %32 = vector.broadcast %cst_25 : f32 to vector<2x128xf32>
    %33 = arith.select %31, %26, %32 : vector<2x128xi1>, vector<2x128xf32>
    %34 = arith.addf %24, %33 : vector<2x128xf32>
    %c0_26 = arith.constant 0 : index
    %c2_27 = arith.constant 2 : index
    %c0_28 = arith.constant 0 : index
    %c0_29 = arith.constant 0 : index
    %35 = vector.load %arg2[%c0_26, %c2_27, %c0_28, %c0_29] : memref<1x4x2x128xf32, #tpu.memory_space<vmem>>, vector<1x1x2x128xf32>
    %36 = vector.shape_cast %35 : vector<1x1x2x128xf32> to vector<2x128xf32>
    %37 = arith.subf %36, %12 : vector<2x128xf32>
    %38 = math.exp %37 : vector<2x128xf32>
    %39 = arith.addf %29, %38 : vector<2x128xf32>
    %c2_i32 = arith.constant 2 : i32
    %40 = vector.broadcast %c2_i32 : i32 to vector<2x128xi32>
    %41 = arith.cmpi eq, %1, %40 : vector<2x128xi32>
    %cst_30 = arith.constant 0.000000e+00 : f32
    %42 = vector.broadcast %cst_30 : f32 to vector<2x128xf32>
    %43 = arith.select %41, %36, %42 : vector<2x128xi1>, vector<2x128xf32>
    %44 = arith.addf %34, %43 : vector<2x128xf32>
    %c0_31 = arith.constant 0 : index
    %c3_32 = arith.constant 3 : index
    %c0_33 = arith.constant 0 : index
    %c0_34 = arith.constant 0 : index
    %45 = vector.load %arg2[%c0_31, %c3_32, %c0_33, %c0_34] : memref<1x4x2x128xf32, #tpu.memory_space<vmem>>, vector<1x1x2x128xf32>
    %46 = vector.shape_cast %45 : vector<1x1x2x128xf32> to vector<2x128xf32>
    %47 = arith.subf %46, %12 : vector<2x128xf32>
    %48 = math.exp %47 : vector<2x128xf32>
    %49 = arith.addf %39, %48 : vector<2x128xf32>
    %c3_i32 = arith.constant 3 : i32
    %50 = vector.broadcast %c3_i32 : i32 to vector<2x128xi32>
    %51 = arith.cmpi eq, %1, %50 : vector<2x128xi32>
    %cst_35 = arith.constant 0.000000e+00 : f32
    %52 = vector.broadcast %cst_35 : f32 to vector<2x128xf32>
    %53 = arith.select %51, %46, %52 : vector<2x128xi1>, vector<2x128xf32>
    %54 = arith.addf %44, %53 : vector<2x128xf32>
    %55 = math.log %49 : vector<2x128xf32>
    %56 = arith.addf %12, %55 : vector<2x128xf32>
    %c-100_i32 = arith.constant -100 : i32
    %57 = vector.broadcast %c-100_i32 : i32 to vector<2x128xi32>
    %58 = arith.cmpi ne, %1, %57 : vector<2x128xi32>
    %59 = arith.subf %56, %54 : vector<2x128xf32>
    %cst_36 = arith.constant 0.000000e+00 : f32
    %60 = vector.broadcast %cst_36 : f32 to vector<2x128xf32>
    %61 = arith.select %58, %59, %60 : vector<2x128xi1>, vector<2x128xf32>
    %c0_37 = arith.constant 0 : index
    %c0_38 = arith.constant 0 : index
    %c0_39 = arith.constant 0 : index
    %62 = vector.load %arg4[%c0_37, %c0_38, %c0_39] : memref<1x2x128xf32, #tpu.memory_space<vmem>>, vector<1x2x128xf32>
    %63 = vector.shape_cast %62 : vector<1x2x128xf32> to vector<2x128xf32>
    %64 = vector.shape_cast %61 : vector<2x128xf32> to vector<1x2x128xf32>
    tpu.vector_store %arg4[%c0_37, %c0_38, %c0_39], %64 {strides = array<i32>} : memref<1x2x128xf32, #tpu.memory_space<vmem>>, vector<1x2x128xf32>,
    return
  }
  func.func @transform_0(%arg0: i32, %arg1: i32) -> (i32, i32, i32, i32) {
    %c0_i32 = arith.constant 0 : i32
    %c0_i32_0 = arith.constant 0 : i32
    %c0_i32_1 = arith.constant 0 : i32
    return %arg0, %c0_i32, %arg1, %c0_i32_0 : i32, i32, i32, i32
  }
  func.func @transform_1(%arg0: i32, %arg1: i32) -> (i32, i32, i32) {
    %c0_i32 = arith.constant 0 : i32
    %c0_i32_0 = arith.constant 0 : i32
    return %arg0, %arg1, %c0_i32 : i32, i32, i32
  }
  func.func @transform_2(%arg0: i32, %arg1: i32) -> (i32, i32, i32) {
    %c0_i32 = arith.constant 0 : i32
    %c0_i32_0 = arith.constant 0 : i32
    return %arg0, %arg1, %c0_i32 : i32, i32, i32
  }
}

</mosaic_0001>

<bundles_post_ra>
// kernel: tpu_custom_call.1
= control target key start
LH: loop header
LB: loop body
LE: loop exit
PB: predicated region body
PF: predicated region fallthrough
CT: control target
= control target key end

     0   :  { %7 = vsyncpa [#allocation3], 0  ;;  %s872_s0 = inlined_call_operand.hbm [shape: f32[2,4,2,128], index: 0, kind: input, shape index: {}]   ;;  %s873_s1 = inlined_call_operand.hbm [shape: s32[2,2,128], index: 1, kind: input, shape index: {}]   ;;  %s874_s2 = inlined_call_operand.hbm [shape: f32[2,2,128], index: 2, kind: output, shape index: {}]  }
   0x1   :  { %9 = vsyncpa [#allocation3 + $0x1], 0 }
   0x2   :  { %10 = vsyncpa [#allocation6], 0 }
   0x3   :  { %12 = vsyncpa [#allocation6 + $0x1], 0 }
   0x4   :  { %13 = vsyncpa [#allocation4], 0 }
   0x5   :  { %15 = vsyncpa [#allocation4 + $0x1], 0  ;;  %s653_s9 = smov 0   ;;  %s655_s10 = smov 0  }
   0x6   :  { %s657_s11 = smov 0   ;;  %s659_s12 = smov 0  }
   0x7   :  { %s661_s13 = smov 0   ;;  %s663_s14 = smov 0  }
   0x8 LB: > { %s385_s15 = sadd.s32 4294967295, %s631_s14   ;;  %s386_s16 = sadd.s32 4294967294, %s631_s14   ;;  %s631_s14 = sphi %s663_s14, %s21_s14   ;;  %s627_s13 = sphi %s661_s13, %s893_s13   ;;  %s623_s12 = sphi %s659_s12, %s892_s12   ;;  %s619_s11 = sphi %s657_s11, %s891_s11   ;;  %s615_s10 = sphi %s655_s10, %s890_s10   ;;  %s611_s9 = sphi %s653_s9, %s889_s9  }
   0x9   : > { %s33_s17 = sadd.s32 1, %s627_s13  ;;  %s42_s18 = sadd.s32 1, %s619_s11 }
   0xa   : > { %p35_p0 = scmp.ge.s32.totalorder %s33_s17, 2  ;;  %p49_p1 = scmp.ne.s32.totalorder %s619_s11, %s615_s10 }
   0xb   : > { %p50_p2 = scmp.eq.s32.totalorder %s631_s14, 0  ;;  %p55_p3 = scmp.ne.s32.totalorder %s615_s10, %s611_s9 }
   0xc   : > { %s895_s17 = smov (%p35_p0, %s33_s17), 0  ;;  %p56_p5 = scmp.eq.s32.totalorder %s385_s15, 0 }
   0xd   : > { %p694_p4 = por %p50_p2, %p49_p1  ;;  %s37_s20 = ssub.s32 %s627_s13, %s895_s17 }
   0xe   : > { %p109_p6 = scmp.eq.s32.totalorder %s385_s15, 1  ;;  %p40_p7 = scmp.eq.s32.totalorder %s37_s20, 0 }
   0xf   : > { %p700_p8 = por %p56_p5, %p55_p3  ;;  %p115_p10 = scmp.eq.s32.totalorder %s386_s16, 1 }
  0x10   : > { %p704_p9 = por %p109_p6, %p49_p1  ;;  %p423_p13 = scmp.lt.s32.totalorder %s631_s14, 2 }
  0x11   : > { %s878_s21 = scalar_select %p700_p8, 1, 0 }
  0x12   : > { %s879_s22 = scalar_select %p704_p9, 1, 0 }
  0x13   : > { %s709_s23 = scalar_select %p40_p7, %s619_s11, %s42_s18  }
  0x14   : > { %p711_p11 = por %p115_p10, %p55_p3  ;;  %s718_s25 = sand.u32 1, %s619_s11  }
  0x15   : > { %s389_s26 = sshll.u32 %s718_s25, 3  ;;  %s405_s27 = sshll.u32 %s627_s13, 7 }
  0x16   : > { %s880_s24 = scalar_select %p711_p11, 1, 0 }
  0x17   : > { %s725_s30 = scalar_lea.hbm %s872_s0, %s405_s27  ;;  %s139_s3 = scalar_lea.vmem [#allocation2], %s389_s26 }
  0x18   : > { %s147_s4 = sshll.u32 %s139_s3, 4  ;;  %p731_p0 = pnand %p423_p13, %p694_p4  ;;  %s727_s4 = int_to_ptr.vmem [resolvable:$true] %s147_s4 }
  0x19   : > { %s136_s6 = scalar_lea.sflag [#allocation3], %s718_s25  ;;  %s485_s7 = scalar_lea.hbm %s725_s30, 128 }
  0x1a   : > { %p486_p2 = scmp.ne.s32.totalorder %s725_s30, %s485_s7  ;;  %p487_p3 = pneg %p731_p0 }
  0x1b   : > { %s490_s16 = scalar_lea.hbm %s872_s0, 256  ;;  %p491_p4 = scmp.lt.u32.totalorder %s725_s30, %s872_s0 }
  0x1c   : > { %p488_p5 = pnand %p487_p3, %p486_p2  ;;  %p492_p7 = scmp.lt.u32.totalorder %s490_s16, %s485_s7 }
  0x1d   : > { %p494_p13 = scmp.lt.u32.totalorder %s485_s7, %s725_s30 }
  0x1e   : > { %p489_p6 = pneg %p488_p5  ;;  %p493_p10 = por %p492_p7, %p491_p4 }
  0x20   : > { %p495_p12 = por %p494_p13, %p493_p10 }
  0x22   : > { %p496_p1 = pnand %p495_p12, %p489_p6 }
  0x24   : > { %499 = shalt.err (!%p496_p1)
}
  0x25   : > { %s500_s20 = scalar_lea.vmem %s727_s4, 128  ;;  %s633_s26 = smov [#allocation2]  }
  0x26   : > { %p501_p2 = scmp.ne.s32.totalorder %s727_s4, %s500_s20  ;;  %s505_s27 = sshll.u32 %s633_s26, 4  ;;  %s506_s27 = int_to_ptr.vmem [resolvable:$false] %s505_s27 }
  0x27   : > { %s507_s28 = scalar_lea.vmem %s506_s27, 256  ;;  %p508_p9 = scmp.lt.s32.totalorder %s727_s4, %s506_s27 }
  0x28   : > { %p503_p5 = pnand %p501_p2, %p487_p3  ;;  %p509_p4 = scmp.lt.s32.totalorder %s507_s28, %s500_s20 }
  0x2a   : > { %p504_p11 = pneg %p503_p5  ;;  %p510_p7 = por %p509_p4, %p508_p9 }
  0x2c   : > { %p511_p10 = pnand %p510_p7, %p504_p11 }
  0x2e   : > { %514 = shalt.err (!%p511_p10)
}
  0x2f   : > { %s634_s29 = smov 32   ;;  %s635_s3 = smov 2  }
  0x30   : > { %415 = dma.hbm_to_vmem [thread:$0]  (!%p731_p0), %s725_s30, 128, %s727_s4, %s136_s6, %s634_s29, %s634_s29, %s635_s3  }
  0x31   : > { %p174_p12 = scmp.lt.s32.totalorder %s631_s14, 3  ;;  %s392_s7 = sshll.u32 %s718_s25, 1 }
  0x32   : > { %s393_s8 = sshll.u32 %s627_s13, 5  ;;  %p882_p9 = scmp.ge.s32.totalorder %s631_s14, 1 }
  0x33   : > { %s776_s19 = scalar_lea.hbm %s873_s1, %s393_s8  ;;  %s161_s20 = scalar_lea.vmem [#allocation5], %s392_s7 }
  0x34   : > { %p769_p11 = pnand %p882_p9, %p174_p12  ;;  %s169_s26 = sshll.u32 %s161_s20, 4  ;;  %s170_s26 = int_to_ptr.vmem [resolvable:$true] %s169_s26 }
  0x35   : > { %s158_s30 = scalar_lea.sflag [#allocation6], %s718_s25  ;;  %s515_s4 = scalar_lea.hbm %s776_s19, 32 }
  0x36   : > { %s883_s15 = scalar_select %p769_p11, 1, 0 }
  0x37   : > { %p516_p1 = scmp.ne.s32.totalorder %s776_s19, %s515_s4  ;;  %s520_s28 = scalar_lea.hbm %s873_s1, 64 }
  0x38   : > { %p521_p2 = scmp.lt.u32.totalorder %s776_s19, %s873_s1  ;;  %p522_p5 = scmp.lt.u32.totalorder %s520_s28, %s515_s4 }
  0x39   : > { %p518_p6 = pnand %p516_p1, %p487_p3  ;;  %p524_p7 = scmp.lt.u32.totalorder %s515_s4, %s776_s19 }
  0x3a   : > { %p523_p4 = por %p522_p5, %p521_p2 }
  0x3b   : > { %p519_p13 = pneg %p518_p6 }
  0x3c   : > { %p525_p10 = por %p524_p7, %p523_p4 }
  0x3e   : > { %p526_p12 = pnand %p525_p10, %p519_p13 }
  0x40   : > { %529 = shalt.err (!%p526_p12)
}
  0x41   : > { %s530_s25 = scalar_lea.vmem %s170_s26, 32  ;;  %s636_s7 = smov [#allocation5]  }
  0x42   : > { %p531_p9 = scmp.ne.s32.totalorder %s170_s26, %s530_s25  ;;  %s535_s8 = sshll.u32 %s636_s7, 4  ;;  %s536_s8 = int_to_ptr.vmem [resolvable:$false] %s535_s8 }
  0x43   : > { %s537_s16 = scalar_lea.vmem %s536_s8, 64  ;;  %p538_p8 = scmp.lt.s32.totalorder %s170_s26, %s536_s8 }
  0x44   : > { %p533_p1 = pnand %p531_p9, %p487_p3  ;;  %p539_p11 = scmp.lt.s32.totalorder %s537_s16, %s530_s25 }
  0x46   : > { %p534_p6 = pneg %p533_p1  ;;  %p540_p2 = por %p539_p11, %p538_p8 }
  0x48   : > { %p541_p5 = pnand %p540_p2, %p534_p6 }
  0x4a   : > { %544 = shalt.err (!%p541_p5)
}
  0x4b   : > { %418 = dma.hbm_to_vmem [thread:$0]  (!%p731_p0), %s776_s19, 32, %s170_s26, %s158_s30  }
  0x4c   : > { %p884_p13 = scmp.ne.s32.totalorder %s883_s15, 0 }
  0x4d   : > { %s801_s18 = sand.u32 (!%p884_p13), 1, %s615_s10   ;;  %p885_p3 = scmp.ne.s32.totalorder (!%p884_p13), %s878_s21, 0 }
  0x4e   : > { %178 = sbr.rel (%p884_p13) target bundleno = 150 (0x96), region = 28  ;;  %s395_s20 = sshll.u32 (!%p884_p13), %s801_s18, 3 }
  0x4f   : > { %s181_s4 = scalar_lea.sflag (!%p884_p13), [#allocation3], %s801_s18  ;;  %s184_s6 = scalar_lea.vmem (!%p884_p13), [#allocation2], %s395_s20 }
  0x55   : > { %598 = dma.done.wait (%p885_p3), %s181_s4, 128  }
  0x56   : > { %600 = vsyncadd (%p885_p3), %s181_s4, 4294967168  ;;  %s396_s5 = sshll.u32 %s801_s18, 1  ;;  %s190_s15 = scalar_lea.sflag [#allocation6], %s801_s18 }
  0x57   : > { %s193_s19 = scalar_lea.vmem [#allocation5], %s396_s5 }
  0x58   : > { %602 = dma.done.wait (%p885_p3), %s190_s15, 32  }
  0x59   : > { %604 = vsyncadd (%p885_p3), %s190_s15, 4294967264  ;;  %v220_v0 = vld [vmem:[%s184_s6] sm:$0x3]  ;;  %v398_v1 = vld [vmem:[%s184_s6 + $0x2] sm:$0x3]  ;;  %s218_s21 = scalar_lea.vmem [#allocation7], %s396_s5 }
  0x5a   : > { %v223_v2 = vmax.f32 %v220_v0, %v398_v1  ;;  %v399_v3 = vld [vmem:[%s184_s6 + $0x4] sm:$0x3]  ;;  %v400_v4 = vld [vmem:[%s184_s6 + $0x6] sm:$0x3]  ;;  %v219_v18 = vld [vmem:[%s193_s19] sm:$0x3] }
  0x5b   : > { %vm234_vm0 = vcmp.eq.s32.totalorder %v219_v18, 0  ;;  %vm241_vm1 = vcmp.eq.s32.totalorder %v219_v18, 1  ;;  %vm248_vm2 = vcmp.eq.s32.totalorder %v219_v18, 2  ;;  %vm255_vm3 = vcmp.eq.s32.totalorder %v219_v18, 3  ;;  %s280_s26 = sshll.u32 %s218_s21, 4  ;;  %s402_s30 = sshll.u32 %s623_s12, 5  ;;  %s820_s26 = int_to_ptr.vmem [resolvable:$true] %s280_s26 }
  0x5c   : > { %v226_v5 = vmax.f32 %v223_v2, %v399_v3  ;;  %v235_v23 = vsel %vm234_vm0, %v220_v0, 0.0  ;;  %v242_v24 = vsel %vm241_vm1, %v398_v1, 0.0  ;;  %v249_v26 = vsel %vm248_vm2, %v399_v3, 0.0  ;;  %s825_s29 = scalar_lea.hbm %s874_s2, %s402_s30  ;;  %s266_s3 = scalar_lea.sflag [#allocation4], %s801_s18 }
  0x5d   : > { %v243_v25 = vadd.f32 %v242_v24, %v235_v23  ;;  %v256_v28 = vsel %vm255_vm3, %v400_v4, 0.0  ;;  %vm261_vm4 = vcmp.ne.s32.totalorder %v219_v18, 4294967196  ;;  %s545_s25 = scalar_lea.vmem %s820_s26, 32  ;;  %p886_p0 = scmp.ne.s32.totalorder %s879_s22, 0 }
  0x5e   : > { %v229_v6 = vmax.f32 %v226_v5, %v400_v4  ;;  %p546_p8 = scmp.ne.s32.totalorder %s820_s26, %s545_s25  ;;  %s637_s12 = smov [#allocation7]  }
  0x5f   : > { %v250_v27 = vadd.f32 %v249_v26, %v243_v25  ;;  %s549_s7 = sshll.u32 %s637_s12, 4  ;;  %s550_s7 = int_to_ptr.vmem [resolvable:$false] %s549_s7 }
  0x60   : > { %v230_v7 = vsub.f32 %v220_v0, %v229_v6  ;;  %v237_v8 = vsub.f32 %v398_v1, %v229_v6  ;;  %v244_v9 = vsub.f32 %v399_v3, %v229_v6  ;;  %v251_v10 = vsub.f32 %v400_v4, %v229_v6  ;;  %p547_p11 = pnand %p546_p8, %p886_p0  ;;  %s551_s8 = scalar_lea.vmem %s550_s7, 64 }
  0x61   : > { %v257_v30 = vadd.f32 %v256_v28, %v250_v27  ;;  %p552_p7 = scmp.lt.s32.totalorder %s820_s26, %s550_s7  ;;  %p553_p10 = scmp.lt.s32.totalorder %s551_s8, %s545_s25 }
  0x62   : > { %v231_v11 = vmul.f32 1.442695, %v230_v7  ;;  %v238_v12 = vmul.f32 1.442695, %v237_v8  ;;  %v245_v13 = vmul.f32 1.442695, %v244_v9  ;;  %p548_p4 = pneg %p547_p11 }
  0x63   : > { %v252_v14 = vmul.f32 1.442695, %v251_v10  ;;  %p554_p12 = por %p553_p10, %p552_p7 }
  0x64   : > { %475 = vpow2.f32 %v231_v11 }
  0x65   : > { %477 = vpow2.f32 %v238_v12  ;;  %p555_p9 = pnand %p554_p12, %p548_p4 }
  0x66   : > { %479 = vpow2.f32 %v245_v13 }
  0x67   : > { %481 = vpow2.f32 %v252_v14 }
  0x6e   : > { %v476_v15 = vpop.eup %475 }
  0x6f   : > { %v478_v16 = vpop.eup %477 }
  0x70   : > { %v480_v17 = vpop.eup %479  ;;  %v240_v19 = vadd.f32 %v478_v16, %v476_v15 }
  0x71   : > { %v482_v20 = vpop.eup %481 }
  0x72   : > { %v247_v21 = vadd.f32 %v480_v17, %v240_v19 }
  0x74   : > { %v254_v22 = vadd.f32 %v482_v20, %v247_v21 }
  0x76   : > { %483 = vlog2.f32 %v254_v22 }
  0x80   : > { %v484_v29 = vpop.eup %483 }
  0x81   : > { %v259_v31 = vmul.f32 0.6931472, %v484_v29 }
  0x83   : > { %v260_v32 = vadd.f32 %v259_v31, %v229_v6 }
  0x85   : > { %v262_v33 = vsub.f32 %v260_v32, %v257_v30 }
  0x87   : > { %v263_v34 = vsel %vm261_vm4, %v262_v33, 0.0 }
  0x88   : > { %264 = vst [vmem:[%s218_s21] sm:$0x3] %v263_v34 }
  0x89   : > { %558 = shalt.err (!%p555_p9)
}
  0x8a   : > { %s559_s16 = scalar_lea.hbm %s825_s29, 32  ;;  %s563_s4 = scalar_lea.hbm %s874_s2, 64 }
  0x8b   : > { %p560_p1 = scmp.ne.s32.totalorder %s825_s29, %s559_s16  ;;  %p564_p5 = scmp.lt.u32.totalorder %s825_s29, %s874_s2 }
  0x8c   : > { %p565_p13 = scmp.lt.u32.totalorder %s563_s4, %s559_s16  ;;  %p567_p8 = scmp.lt.u32.totalorder %s559_s16, %s825_s29 }
  0x8d   : > { %p561_p6 = pnand %p560_p1, %p886_p0 }
  0x8e   : > { %p566_p3 = por %p565_p13, %p564_p5 }
  0x8f   : > { %p562_p2 = pneg %p561_p6 }
  0x90   : > { %p568_p11 = por %p567_p8, %p566_p3 }
  0x92   : > { %p569_p4 = pnand %p568_p11, %p562_p2 }
  0x94   : > { %572 = shalt.err (!%p569_p4)
}
  0x95   : > { %410 = dma.vmem_to_hbm [thread:$0]  (%p886_p0), %s820_s26, 32, %s825_s29, %s266_s3  }
  0x96 PF: > { %s292_s15 = sand.u32 1, %s611_s9   ;;  %p887_p7 = scmp.ne.s32.totalorder %s880_s24, 0 }
  0x97   : > { %p888_p10 = scmp.ge.s32.totalorder %s631_s14, 2  ;;  %s293_s19 = scalar_lea.sflag [#allocation4], %s292_s15 }
  0x99   : > { %p420_p12 = pnand %p888_p10, %p887_p7 }
  0x9b   : > { %606 = dma.done.wait (!%p420_p12), %s293_s19, 32  }
  0x9c   : > { %608 = vsyncadd (!%p420_p12), %s293_s19, 4294967264  ;;  %s21_s14 = sadd.s32 1, %s631_s14   ;;  %s889_s9 = smov %s615_s10 }
  0x9d   : > { %p18_p9 = scmp.ge.s32.totalorder %s21_s14, 4   ;;  %s890_s10 = smov %s619_s11 }
  0x9e   : > { %s891_s11 = smov %s709_s23  ;;  %s892_s12 = smov %s627_s13 }
  0x9f   : > { %s893_s13 = smov %s895_s17  ;;  %20 = sbr.rel (!%p18_p9) target bundleno = 8 (0x8), region = 89 }
  0xa6   :  { %298 = vsyncpa [#allocation3], 1 }
  0xa7   :  { %300 = vsyncpa [#allocation3 + $0x1], 1 }
  0xa8   :  { %301 = vsyncpa [#allocation6], 1 }
  0xa9   :  { %303 = vsyncpa [#allocation6 + $0x1], 1 }
  0xaa   :  { %304 = vsyncpa [#allocation4], 1 }
  0xab   :  { %306 = vsyncpa [#allocation4 + $0x1], 1 }

</bundles_post_ra>
